<compile_context>
chip_gen: v7x
topology: tpu7x:2x2x1
jax: 0.10.0
libtpu: 0.0.40
codegen_flags: <defaults>
</compile_context>

<pallas_src>
import functools

import jax
import jax.numpy as jnp
from jax.experimental import pallas as pl
from jax.experimental.pallas import tpu as pltpu


MASK_RATIO = 0.3
MASK_VALUE = 0.0  # unused by the reference forward (x * bool_mask always yields 0)


def _specshot_kernel(x_ref, u_ref, o_ref, *, keep_prob):
    # x_ref/u_ref/o_ref: (block_rows, T) VMEM tiles.
    # keep element iff (1 - u) > mask_ratio  <=>  u < 1 - mask_ratio
    x = x_ref[...]
    keep = u_ref[...] < jnp.float32(keep_prob)
    o_ref[...] = jnp.where(keep, x, jnp.zeros_like(x))


def _pick_block_rows(n_rows, n_cols, row_align, target_bytes=2 << 20):
    """Largest row-block that is a multiple of `row_align`, divides n_rows, and
    keeps one f32 block around `target_bytes` (so in+in+out double-buffered
    stays well under every generation's scoped-VMEM default)."""
    bytes_per_row = max(1, n_cols) * 4  # size against the f32 uniform input
    max_rows = max(row_align, target_bytes // bytes_per_row)
    if n_rows <= max_rows or n_rows % row_align != 0:
        return n_rows  # full extent is always a legal block shape
    br = (min(max_rows, n_rows) // row_align) * row_align
    while br >= row_align:
        if n_rows % br == 0:
            return br
        br -= row_align
    return n_rows


def specshot(input_spec, key, mask_ratio=MASK_RATIO):
    """input_spec: (B, F, T) float array. Returns randomly masked copy."""
    B, F, T = input_spec.shape
    R = B * F
    x2d = input_spec.reshape(R, T)

    # Uniform [0,1) draws, one per element (matches torch.rand in the reference).
    u = jax.random.uniform(key, (R, T), dtype=jnp.float32)

    elem = jnp.dtype(input_spec.dtype).itemsize
    row_align = 16 if elem < 4 else 8  # bf16 packs [16,128] per vreg
    br = _pick_block_rows(R, T, row_align)
    grid = (R // br,)

    cost = pl.CostEstimate(
        flops=2 * R * T,
        transcendentals=0,
        bytes_accessed=R * T * (2 * elem + 4),
    )

    out2d = pl.pallas_call(
        functools.partial(_specshot_kernel, keep_prob=1.0 - mask_ratio),
        out_shape=jax.ShapeDtypeStruct((R, T), input_spec.dtype),
        grid=grid,
        in_specs=[
            pl.BlockSpec((br, T), lambda i: (i, 0)),
            pl.BlockSpec((br, T), lambda i: (i, 0)),
        ],
        out_specs=pl.BlockSpec((br, T), lambda i: (i, 0)),
        compiler_params=pltpu.CompilerParams(
            dimension_semantics=("parallel",),
        ),
        cost_estimate=cost,
    )(x2d, u)

    return out2d.reshape(B, F, T)


if __name__ == "__main__":
    key = jax.random.PRNGKey(0)
    k_data, k_mask = jax.random.split(key)

    B, F, T = 2, 16, 128  # (batch, freq, time); T lane-aligned, F sublane-aligned
    x = jax.random.normal(k_data, (B, F, T), dtype=jnp.float32)

    out = specshot(x, k_mask)
    out = jax.block_until_ready(out)

    # Sanity: every output element is either exactly the input or exactly 0,
    # and the kept fraction is roughly (1 - MASK_RATIO).
    kept = (out == x)
    zeroed = (out == 0.0)
    assert bool(jnp.all(kept | zeroed)), "every element must be kept or zeroed"
    keep_frac = float(jnp.mean(kept.astype(jnp.float32)))
    assert 0.45 < keep_frac < 0.95, f"unexpected keep fraction {keep_frac}"
    assert out.shape == x.shape and out.dtype == x.dtype

    print("KERNEL_OK")
</pallas_src>

<mosaic_0001>
module attributes {stable_mosaic.version = 11 : i64} {
  func.func @_specshot_kernel(%arg0: i32, %arg1: memref<32x128xf32, #tpu.memory_space<vmem>>, %arg2: memref<32x128xf32, #tpu.memory_space<vmem>>, %arg3: memref<32x128xf32, #tpu.memory_space<vmem>>) attributes {dimension_semantics = [#tpu.dimension_semantics<parallel>], iteration_bounds = array<i64: 1>, scalar_prefetch = 0 : i64, scratch_operands = 0 : i64, tpu.core_type = #tpu.core_type<tc>, window_params = [{transform_indices = @transform_0, window_bounds = array<i64: 32, 128>}, {transform_indices = @transform_1, window_bounds = array<i64: 32, 128>}, {transform_indices = @transform_2, window_bounds = array<i64: 32, 128>}]} {
    %c0 = arith.constant 0 : index
    %c0_0 = arith.constant 0 : index
    %0 = vector.load %arg1[%c0, %c0_0] : memref<32x128xf32, #tpu.memory_space<vmem>>, vector<32x128xf32>
    %c0_1 = arith.constant 0 : index
    %c0_2 = arith.constant 0 : index
    %1 = vector.load %arg2[%c0_1, %c0_2] : memref<32x128xf32, #tpu.memory_space<vmem>>, vector<32x128xf32>
    %cst = arith.constant 0.699999988 : f32
    %2 = vector.broadcast %cst : f32 to vector<32x128xf32>
    %3 = arith.cmpf olt, %1, %2 : vector<32x128xf32>
    %cst_3 = arith.constant 0.000000e+00 : f32
    %4 = vector.broadcast %cst_3 : f32 to vector<32x128xf32>
    %5 = arith.select %3, %0, %4 : vector<32x128xi1>, vector<32x128xf32>
    %c0_4 = arith.constant 0 : index
    %c0_5 = arith.constant 0 : index
    %6 = vector.load %arg3[%c0_4, %c0_5] : memref<32x128xf32, #tpu.memory_space<vmem>>, vector<32x128xf32>
    tpu.vector_store %arg3[%c0_4, %c0_5], %5 {strides = array<i32>} : memref<32x128xf32, #tpu.memory_space<vmem>>, vector<32x128xf32>,
    return
  }
  func.func @transform_0(%arg0: i32) -> (i32, i32) {
    %c0_i32 = arith.constant 0 : i32
    %c0_i32_0 = arith.constant 0 : i32
    return %arg0, %c0_i32 : i32, i32
  }
  func.func @transform_1(%arg0: i32) -> (i32, i32) {
    %c0_i32 = arith.constant 0 : i32
    %c0_i32_0 = arith.constant 0 : i32
    return %arg0, %c0_i32 : i32, i32
  }
  func.func @transform_2(%arg0: i32) -> (i32, i32) {
    %c0_i32 = arith.constant 0 : i32
    %c0_i32_0 = arith.constant 0 : i32
    return %arg0, %c0_i32 : i32, i32
  }
}

</mosaic_0001>

<bundles_post_ra>
// kernel: tpu_custom_call.1
= control target key start
LH: loop header
LB: loop body
LE: loop exit
PB: predicated region body
PF: predicated region fallthrough
CT: control target
= control target key end

     0   :  { %7 = vsyncpa [#allocation3], 0  ;;  %s220_s0 = inlined_call_operand.hbm [shape: f32[32,128], index: 0, kind: input, shape index: {}]   ;;  %s221_s1 = inlined_call_operand.hbm [shape: f32[32,128], index: 1, kind: input, shape index: {}]   ;;  %s222_s2 = inlined_call_operand.hbm [shape: f32[32,128], index: 2, kind: output, shape index: {}]  }
   0x1   :  { %8 = vsyncpa [#allocation6], 0 }
   0x2   :  { %9 = vsyncpa [#allocation4], 0  ;;  %s155_s9 = smov [#allocation2]   ;;  %s83_s13 = scalar_lea.hbm %s220_s0, 512 }
   0x3   :  { %s15_s10 = sshll.u32 %s155_s9, 4  ;;  %p84_p0 = scmp.ne.s32.totalorder %s220_s0, %s83_s13  ;;  %s16_s10 = int_to_ptr.vmem [resolvable:$true] %s15_s10 }
   0x4   :  { %p87_p1 = scmp.lt.u32.totalorder %s83_s13, %s220_s0 }
   0x6   :  { %p89_p2 = pnand %p87_p1, %p84_p0 }
   0x8   :  { %92 = shalt.err (!%p89_p2)
}
   0x9   :  { %s93_s18 = scalar_lea.vmem %s16_s10, 512  ;;  %p98_p4 = scmp.lt.s32.totalorder %s16_s10, %s16_s10 }
   0xa   :  { %p94_p3 = scmp.ne.s32.totalorder %s16_s10, %s93_s18  ;;  %p99_p5 = scmp.lt.s32.totalorder %s93_s18, %s93_s18 }
   0xc   :  { %p100_p6 = por %p99_p5, %p98_p4 }
   0xe   :  { %p101_p7 = pnand %p100_p6, %p94_p3 }
  0x10   :  { %104 = shalt.err (!%p101_p7)
}
  0x11   :  { %s156_s19 = smov 128   ;;  %s157_s20 = smov 8  }
  0x12   :  { %21 = dma.hbm_to_vmem [thread:$0]  %s220_s0, 512, %s16_s10, [#allocation3], %s156_s19, %s156_s19, %s157_s20  }
  0x13   :  { %s158_s23 = smov [#allocation5]   ;;  %s105_s27 = scalar_lea.hbm %s221_s1, 512 }
  0x14   :  { %s27_s24 = sshll.u32 %s158_s23, 4  ;;  %p106_p8 = scmp.ne.s32.totalorder %s221_s1, %s105_s27  ;;  %s28_s24 = int_to_ptr.vmem [resolvable:$true] %s27_s24 }
  0x15   :  { %p109_p9 = scmp.lt.u32.totalorder %s105_s27, %s221_s1 }
  0x17   :  { %p111_p10 = pnand %p109_p9, %p106_p8 }
  0x19   :  { %114 = shalt.err (!%p111_p10)
}
  0x1a   :  { %s115_s4 = scalar_lea.vmem %s28_s24, 512  ;;  %p120_p12 = scmp.lt.s32.totalorder %s28_s24, %s28_s24 }
  0x1b   :  { %p116_p11 = scmp.ne.s32.totalorder %s28_s24, %s115_s4  ;;  %p121_p13 = scmp.lt.s32.totalorder %s115_s4, %s115_s4 }
  0x1d   :  { %p122_p0 = por %p121_p13, %p120_p12 }
  0x1f   :  { %p123_p1 = pnand %p122_p0, %p116_p11 }
  0x21   :  { %126 = shalt.err (!%p123_p1)
}
  0x22   :  { %33 = dma.hbm_to_vmem [thread:$0]  %s221_s1, 512, %s28_s24, [#allocation6], %s156_s19, %s156_s19, %s157_s20  }
  0x23   :  { %149 = dma.done.wait [#allocation3], 512  }
  0x24   :  { %150 = vsyncadd [#allocation3], 4294966784 }
  0x25   :  { %151 = dma.done.wait [#allocation6], 512  }
  0x26   :  { %152 = vsyncadd [#allocation6], 4294966784  ;;  %v40_v0 = vld [vmem:[#allocation2] sm:$0xff]  ;;  %v41_v2 = vld [vmem:[#allocation2 + $0x8] sm:$0xff]  ;;  %s159_s6 = smov [#allocation7]  }
  0x27   :  { %v44_v1 = vld [vmem:[#allocation5] sm:$0xff]  ;;  %v45_v3 = vld [vmem:[#allocation5 + $0x8] sm:$0xff]  ;;  %v42_v4 = vld [vmem:[#allocation2 + $0x10] sm:$0xff]  ;;  %s65_s7 = sshll.u32 %s159_s6, 4  ;;  %s66_s7 = int_to_ptr.vmem [resolvable:$true] %s65_s7 }
  0x28   :  { %vm48_vm0 = vcmp.lt.f32.partialorder %v44_v1, 0.7  ;;  %v46_v5 = vld [vmem:[#allocation5 + $0x10] sm:$0xff]  ;;  %vm49_vm1 = vcmp.lt.f32.partialorder %v45_v3, 0.7  ;;  %v43_v7 = vld [vmem:[#allocation2 + $0x18] sm:$0xff]  ;;  %p132_p3 = scmp.lt.s32.totalorder %s66_s7, %s66_s7 }
  0x29   :  { %v52_v6 = vsel %vm48_vm0, %v40_v0, 0.0  ;;  %vm50_vm2 = vcmp.lt.f32.partialorder %v46_v5, 0.7  ;;  %v53_v8 = vsel %vm49_vm1, %v41_v2, 0.0  ;;  %v47_v10 = vld [vmem:[#allocation5 + $0x18] sm:$0xff]  ;;  %s127_s1 = scalar_lea.vmem %s66_s7, 512 }
  0x2a   :  { %56 = vst [vmem:[#allocation7] sm:$0xff] %v52_v6  ;;  %v54_v9 = vsel %vm50_vm2, %v42_v4, 0.0  ;;  %57 = vst [vmem:[#allocation7 + $0x8] sm:$0xff] %v53_v8  ;;  %vm51_vm3 = vcmp.lt.f32.partialorder %v47_v10, 0.7  ;;  %p128_p2 = scmp.ne.s32.totalorder %s66_s7, %s127_s1  ;;  %p133_p4 = scmp.lt.s32.totalorder %s127_s1, %s127_s1 }
  0x2b   :  { %58 = vst [vmem:[#allocation7 + $0x10] sm:$0xff] %v54_v9  ;;  %v55_v11 = vsel %vm51_vm3, %v43_v7, 0.0 }
  0x2c   :  { %59 = vst [vmem:[#allocation7 + $0x18] sm:$0xff] %v55_v11  ;;  %p134_p5 = por %p133_p4, %p132_p3 }
  0x2e   :  { %p135_p6 = pnand %p134_p5, %p128_p2 }
  0x30   :  { %138 = shalt.err (!%p135_p6)
}
  0x31   :  { %s139_s10 = scalar_lea.hbm %s222_s2, 512 }
  0x32   :  { %p140_p7 = scmp.ne.s32.totalorder %s222_s2, %s139_s10  ;;  %p143_p8 = scmp.lt.u32.totalorder %s139_s10, %s222_s2 }
  0x34   :  { %p145_p9 = pnand %p143_p8, %p140_p7 }
  0x36   :  { %148 = shalt.err (!%p145_p9)
}
  0x37   :  { %71 = dma.vmem_to_hbm [thread:$0]  %s66_s7, 512, %s222_s2, [#allocation4], %s156_s19, %s156_s19, %s157_s20  }
  0x38   :  { %153 = dma.done.wait [#allocation4], 512  }
  0x39   :  { %154 = vsyncadd [#allocation4], 4294966784 }
  0x3a   :  { %75 = vsyncpa [#allocation3], 1 }
  0x3b   :  { %76 = vsyncpa [#allocation6], 1 }
  0x3c   :  { %77 = vsyncpa [#allocation4], 1 }

</bundles_post_ra>
